<compile_context>
chip_gen: v7x
topology: tpu7x:2x2x1
jax: 0.10.0
libtpu: 0.0.40
codegen_flags: <defaults>
</compile_context>

<pallas_src>
import jax
import jax.numpy as jnp
from jax.experimental import pallas as pl
from jax.experimental.pallas import tpu as pltpu


def _round_up(x, m):
    return ((x + m - 1) // m) * m


def _bn_relu_conv_kernel(x_ref, scale_ref, shift_ref, w_ref, b_ref, o_ref):
    # x_ref:     (Cin,  T)   activation tile; lane dim = spatial, T % 128 == 0
    # scale_ref: (Cin,  1)   folded BN scale  = gamma / sqrt(var + eps)
    # shift_ref: (Cin,  1)   folded BN shift  = beta - mean * scale
    # w_ref:     (Cout, Cin) 1x1 conv weight (bf16 for the MXU)
    # b_ref:     (Cout, 1)   conv bias (f32)
    # o_ref:     (Cout, T)   lane-dense output tile
    x = x_ref[...].astype(jnp.float32)
    x = x * scale_ref[...] + shift_ref[...]            # BatchNorm (inference affine)
    x = jnp.maximum(x, 0.0)                            # ReLU
    y = jnp.dot(w_ref[...], x.astype(w_ref.dtype),     # bf16 MXU, f32 accumulate
                preferred_element_type=jnp.float32)
    o_ref[...] = (y + b_ref[...]).astype(o_ref.dtype)


def bn_relu_conv(x_nchw, gamma, beta, running_mean, running_var,
                 conv_w, conv_b, *, eps=1e-5, tile_hw=512, use_bf16_mxu=True):
    """x_nchw: (N, Cin, H, W) float32; conv_w: (Cout, Cin, 1, 1); conv_b: (Cout,)."""
    N, Cin, H, W = x_nchw.shape
    Cout = conv_w.shape[0]
    assert conv_w.shape == (Cout, Cin, 1, 1), "only 1x1 conv (module defaults)"

    # Fold BN into a per-channel affine (inference / eval() semantics).
    scale = (gamma / jnp.sqrt(running_var + eps)).astype(jnp.float32)   # (Cin,)
    shift = (beta - running_mean * scale).astype(jnp.float32)           # (Cin,)

    HW = H * W
    # Lane-dim tile: multiple of 128, as large as useful (>=512 rows of lanes
    # for HBM-bandwidth efficiency), capped at the padded spatial extent.
    tile = _round_up(min(tile_hw, _round_up(HW, 128)), 128)
    HWp = _round_up(HW, tile)

    x3 = x_nchw.reshape(N, Cin, HW)                  # free reshape, no transpose
    if HWp != HW:                                    # pad tail tile (pointwise op,
        x3 = jnp.pad(x3, ((0, 0), (0, 0), (0, HWp - HW)))  # padding sliced off below)

    w_dtype = jnp.bfloat16 if use_bf16_mxu else jnp.float32
    w_mat = conv_w.reshape(Cout, Cin).astype(w_dtype)          # (Cout, Cin)
    scale2 = scale.reshape(Cin, 1)
    shift2 = shift.reshape(Cin, 1)
    bias2 = conv_b.reshape(Cout, 1).astype(jnp.float32)

    # Spatial tiles lead (largest, megacore-parallel axis on v7x); batch second.
    grid = (HWp // tile, N)

    out3 = pl.pallas_call(
        _bn_relu_conv_kernel,
        out_shape=jax.ShapeDtypeStruct((N, Cout, HWp), x_nchw.dtype),
        grid_spec=pltpu.PrefetchScalarGridSpec(
            num_scalar_prefetch=0,
            grid=grid,
            in_specs=[
                pl.BlockSpec((None, Cin, tile), lambda t, n: (n, 0, t)),   # x
                pl.BlockSpec((Cin, 1), lambda t, n: (0, 0)),               # BN scale
                pl.BlockSpec((Cin, 1), lambda t, n: (0, 0)),               # BN shift
                pl.BlockSpec((Cout, Cin), lambda t, n: (0, 0)),            # weight
                pl.BlockSpec((Cout, 1), lambda t, n: (0, 0)),              # bias
            ],
            out_specs=pl.BlockSpec((None, Cout, tile), lambda t, n: (n, 0, t)),
        ),
        compiler_params=pltpu.CompilerParams(
            dimension_semantics=("parallel", "parallel"),
            vmem_limit_bytes=32 * 1024 * 1024,
        ),
        # TODO(synk): for very large Cin*Cout on v7x (64 MiB VMEM), single-buffer
        # the constant-index weight (pipeline_mode=pl.Buffered(1)) and/or add a
        # Cin grid axis with an f32 VMEM accumulator.
    )(x3, scale2, shift2, w_mat, bias2)

    if HWp != HW:
        out3 = out3[:, :, :HW]
    return out3.reshape(N, Cout, H, W)               # free reshape, no transpose


def _reference(x_nchw, gamma, beta, mean, var, conv_w, conv_b, eps=1e-5,
               matmul_dtype=jnp.float32):
    scale = gamma / jnp.sqrt(var + eps)
    shift = beta - mean * scale
    xb = x_nchw * scale[None, :, None, None] + shift[None, :, None, None]
    xr = jnp.maximum(xb, 0.0)
    w = conv_w.reshape(conv_w.shape[0], conv_w.shape[1])          # (Cout, Cin)
    y = jnp.einsum('nchw,oc->nohw',
                   xr.astype(matmul_dtype), w.astype(matmul_dtype),
                   preferred_element_type=jnp.float32)
    return y + conv_b[None, :, None, None]


if __name__ == "__main__":
    key = jax.random.PRNGKey(0)
    N, Cin, H, W = 2, 4, 16, 16
    Cout = 8

    k = jax.random.split(key, 8)
    x = jax.random.normal(k[0], (N, Cin, H, W), dtype=jnp.float32)

    # Deterministic synthetic parameters (shapes from the module's __init__).
    gamma = 1.0 + 0.1 * jax.random.normal(k[1], (Cin,), dtype=jnp.float32)
    beta = 0.1 * jax.random.normal(k[2], (Cin,), dtype=jnp.float32)
    running_mean = 0.05 * jax.random.normal(k[3], (Cin,), dtype=jnp.float32)
    running_var = jnp.abs(1.0 + 0.1 * jax.random.normal(k[4], (Cin,), dtype=jnp.float32))
    conv_w = 0.2 * jax.random.normal(k[5], (Cout, Cin, 1, 1), dtype=jnp.float32)
    conv_b = 0.1 * jax.random.normal(k[6], (Cout,), dtype=jnp.float32)

    out = bn_relu_conv(x, gamma, beta, running_mean, running_var, conv_w, conv_b)
    out = jax.block_until_ready(out)
    assert out.shape == (N, Cout, H, W)

    # Tight check against a reference using the same bf16-MXU rounding.
    ref_bf16 = _reference(x, gamma, beta, running_mean, running_var, conv_w, conv_b,
                          matmul_dtype=jnp.bfloat16)
    assert jnp.allclose(out, ref_bf16, atol=2e-2, rtol=2e-2)

    # Sanity check against the pure-f32 module semantics (bf16 matmul tolerance).
    ref_f32 = _reference(x, gamma, beta, running_mean, running_var, conv_w, conv_b,
                         matmul_dtype=jnp.float32)
    assert jnp.allclose(out, ref_f32, atol=5e-2, rtol=5e-2)

    print("KERNEL_OK")
</pallas_src>

<mosaic_0001>
module attributes {stable_mosaic.version = 11 : i64} {
  func.func @_bn_relu_conv_kernel(%arg0: i32, %arg1: i32, %arg2: memref<1x4x256xf32, #tpu.memory_space<vmem>>, %arg3: memref<4x1xf32, #tpu.memory_space<vmem>>, %arg4: memref<4x1xf32, #tpu.memory_space<vmem>>, %arg5: memref<8x4xbf16, #tpu.memory_space<vmem>>, %arg6: memref<8x1xf32, #tpu.memory_space<vmem>>, %arg7: memref<1x8x256xf32, #tpu.memory_space<vmem>>) attributes {dimension_semantics = [#tpu.dimension_semantics<parallel>, #tpu.dimension_semantics<parallel>], iteration_bounds = array<i64: 1, 2>, scalar_prefetch = 0 : i64, scratch_operands = 0 : i64, tpu.core_type = #tpu.core_type<tc>, window_params = [{transform_indices = @transform_0, window_bounds = array<i64: 1, 4, 256>}, {pipeline_mode = #tpu.pipeline_mode<synchronous>, transform_indices = @transform_1, window_bounds = array<i64: 4, 1>}, {pipeline_mode = #tpu.pipeline_mode<synchronous>, transform_indices = @transform_2, window_bounds = array<i64: 4, 1>}, {pipeline_mode = #tpu.pipeline_mode<synchronous>, transform_indices = @transform_3, window_bounds = array<i64: 8, 4>}, {pipeline_mode = #tpu.pipeline_mode<synchronous>, transform_indices = @transform_4, window_bounds = array<i64: 8, 1>}, {transform_indices = @transform_5, window_bounds = array<i64: 1, 8, 256>}]} {
    %c0 = arith.constant 0 : index
    %c0_0 = arith.constant 0 : index
    %c0_1 = arith.constant 0 : index
    %0 = vector.load %arg2[%c0, %c0_0, %c0_1] : memref<1x4x256xf32, #tpu.memory_space<vmem>>, vector<1x4x256xf32>
    %1 = vector.shape_cast %0 : vector<1x4x256xf32> to vector<4x256xf32>
    %c0_2 = arith.constant 0 : index
    %c0_3 = arith.constant 0 : index
    %2 = vector.load %arg3[%c0_2, %c0_3] : memref<4x1xf32, #tpu.memory_space<vmem>>, vector<4x1xf32>
    %3 = vector.broadcast %2 : vector<4x1xf32> to vector<4x256xf32>
    %4 = arith.mulf %1, %3 : vector<4x256xf32>
    %c0_4 = arith.constant 0 : index
    %c0_5 = arith.constant 0 : index
    %5 = vector.load %arg4[%c0_4, %c0_5] : memref<4x1xf32, #tpu.memory_space<vmem>>, vector<4x1xf32>
    %6 = vector.broadcast %5 : vector<4x1xf32> to vector<4x256xf32>
    %7 = arith.addf %4, %6 : vector<4x256xf32>
    %cst = arith.constant 0.000000e+00 : f32
    %8 = vector.broadcast %cst : f32 to vector<4x256xf32>
    %9 = arith.maximumf %7, %8 : vector<4x256xf32>
    %c0_6 = arith.constant 0 : index
    %c0_7 = arith.constant 0 : index
    %10 = vector.load %arg5[%c0_6, %c0_7] : memref<8x4xbf16, #tpu.memory_space<vmem>>, vector<8x4xbf16>
    %11 = arith.truncf %9 : vector<4x256xf32> to vector<4x256xbf16>
    %cst_8 = arith.constant dense<0.000000e+00> : vector<8x256xf32>
    %12 = tpu.matmul %10, %11, %cst_8 {dimension_numbers = #tpu.dot_dimension_numbers<[1], [0], [0], [1], [0, 0, 1, 1], [], []>} : vector<8x4xbf16>, vector<4x256xbf16>, vector<8x256xf32> -> vector<8x256xf32>
    %c0_9 = arith.constant 0 : index
    %c0_10 = arith.constant 0 : index
    %13 = vector.load %arg6[%c0_9, %c0_10] : memref<8x1xf32, #tpu.memory_space<vmem>>, vector<8x1xf32>
    %14 = vector.broadcast %13 : vector<8x1xf32> to vector<8x256xf32>
    %15 = arith.addf %12, %14 : vector<8x256xf32>
    %c0_11 = arith.constant 0 : index
    %c0_12 = arith.constant 0 : index
    %c0_13 = arith.constant 0 : index
    %16 = vector.load %arg7[%c0_11, %c0_12, %c0_13] : memref<1x8x256xf32, #tpu.memory_space<vmem>>, vector<1x8x256xf32>
    %17 = vector.shape_cast %16 : vector<1x8x256xf32> to vector<8x256xf32>
    %18 = vector.shape_cast %15 : vector<8x256xf32> to vector<1x8x256xf32>
    tpu.vector_store %arg7[%c0_11, %c0_12, %c0_13], %18 {strides = array<i32>} : memref<1x8x256xf32, #tpu.memory_space<vmem>>, vector<1x8x256xf32>,
    return
  }
  func.func @transform_0(%arg0: i32, %arg1: i32) -> (i32, i32, i32) {
    %c0_i32 = arith.constant 0 : i32
    %c0_i32_0 = arith.constant 0 : i32
    return %arg1, %c0_i32, %arg0 : i32, i32, i32
  }
  func.func @transform_1(%arg0: i32, %arg1: i32) -> (i32, i32) {
    %c0_i32 = arith.constant 0 : i32
    %c0_i32_0 = arith.constant 0 : i32
    %c0_i32_1 = arith.constant 0 : i32
    return %c0_i32, %c0_i32_0 : i32, i32
  }
  func.func @transform_2(%arg0: i32, %arg1: i32) -> (i32, i32) {
    %c0_i32 = arith.constant 0 : i32
    %c0_i32_0 = arith.constant 0 : i32
    %c0_i32_1 = arith.constant 0 : i32
    return %c0_i32, %c0_i32_0 : i32, i32
  }
  func.func @transform_3(%arg0: i32, %arg1: i32) -> (i32, i32) {
    %c0_i32 = arith.constant 0 : i32
    %c0_i32_0 = arith.constant 0 : i32
    %c0_i32_1 = arith.constant 0 : i32
    return %c0_i32, %c0_i32_0 : i32, i32
  }
  func.func @transform_4(%arg0: i32, %arg1: i32) -> (i32, i32) {
    %c0_i32 = arith.constant 0 : i32
    %c0_i32_0 = arith.constant 0 : i32
    %c0_i32_1 = arith.constant 0 : i32
    return %c0_i32, %c0_i32_0 : i32, i32
  }
  func.func @transform_5(%arg0: i32, %arg1: i32) -> (i32, i32, i32) {
    %c0_i32 = arith.constant 0 : i32
    %c0_i32_0 = arith.constant 0 : i32
    return %arg1, %c0_i32, %arg0 : i32, i32, i32
  }
}

</mosaic_0001>

<bundles_post_ra>
// kernel: tpu_custom_call.1
= control target key start
LH: loop header
LB: loop body
LE: loop exit
PB: predicated region body
PF: predicated region fallthrough
CT: control target
= control target key end

     0   :  { %10 = vsyncpa [#allocation3], 0  ;;  %s757_s0 = inlined_call_operand.vmem [shape: f32[2,4,256], index: 0, kind: input, shape index: {}]   ;;  %s758_s1 = inlined_call_operand.vmem [shape: f32[4,1], index: 1, kind: input, shape index: {}]   ;;  %s759_s2 = inlined_call_operand.vmem [shape: f32[4,1], index: 2, kind: input, shape index: {}]   ;;  %s760_s3 = inlined_call_operand.vmem [shape: bf16[8,4], index: 3, kind: input, shape index: {}]   ;;  %s761_s4 = inlined_call_operand.vmem [shape: f32[8,1], index: 4, kind: input, shape index: {}]   ;;  %s762_s5 = inlined_call_operand.hbm [shape: f32[2,8,256], index: 5, kind: output, shape index: {}]  }
   0x1   :  { %12 = vsyncpa [#allocation3 + $0x1], 0  ;;  %s633_s18 = smov 0   ;;  %s635_s19 = smov 0  }
   0x2   :  { %s637_s20 = smov 0   ;;  %s639_s21 = smov 0  }
   0x3   :  { %s641_s22 = smov 0   ;;  %s643_s23 = smov 0  }
   0x4 LB: > { %s444_s24 = sadd.s32 4294967295, %s598_s23   ;;  %s445_s25 = sadd.s32 4294967294, %s598_s23   ;;  %s598_s23 = sphi %s643_s23, %s18_s23   ;;  %s594_s22 = sphi %s641_s22, %s769_s22   ;;  %s590_s21 = sphi %s639_s21, %s768_s21   ;;  %s586_s20 = sphi %s637_s20, %s767_s20   ;;  %s582_s19 = sphi %s635_s19, %s766_s19   ;;  %s578_s18 = sphi %s633_s18, %s765_s18  }
   0x5   : > { %s27_s26 = sadd.s32 1, %s594_s22  ;;  %s151_s27 = sadd.s32 1, %s586_s20 }
   0x6   : > { %p28_p0 = scmp.ge.s32.totalorder %s27_s26, 2  ;;  %p161_p1 = scmp.ne.s32.totalorder %s586_s20, %s582_s19 }
   0x7   : > { %p162_p2 = scmp.eq.s32.totalorder %s444_s24, 1  ;;  %p167_p3 = scmp.ne.s32.totalorder %s582_s19, %s578_s18 }
   0x8   : > { %s771_s26 = smov (%p28_p0, %s27_s26), 0  ;;  %p168_p5 = scmp.eq.s32.totalorder %s445_s25, 1 }
   0x9   : > { %p673_p4 = por %p162_p2, %p161_p1  ;;  %s146_s29 = ssub.s32 %s594_s22, %s771_s26 }
   0xa   : > { %p448_p6 = scmp.ge.s32.totalorder %s598_s23, 1  ;;  %p149_p7 = scmp.eq.s32.totalorder %s146_s29, 0 }
   0xb   : > { %p680_p8 = por %p168_p5, %p167_p3  ;;  %p211_p9 = scmp.lt.s32.totalorder %s598_s23, 3 }
   0xc   : > { %s686_s6 = scalar_select %p149_p7, %s586_s20, %s151_s27  }
   0xd   : > { %p212_p10 = pnand %p448_p6, %p211_p9 }
   0xe   : > { %v256_v0 = vld [vmem:[%s758_s1] sm:$0xf] (!%p212_p10)  ;;  %v600_v1 = vmov (!%p212_p10), 0   ;;  %p244_p11 = scmp.lt.s32.totalorder (!%p212_p10), %s590_s21, 1  ;;  %v601_v4 = vmov (!%p212_p10), 839922192   ;;  %v264_v6 = vlaneseq (!%p212_p10) }
   0xf   : > { %215 = sbr.rel (%p212_p10) target bundleno = 391 (0x187), region = 40  ;;  %518 = vset.pattern.permute.xlu0 (!%p212_p10), %v600_v1  ;;  %340 = vmatprep.mubr.bf16.mxu0 (!%p212_p10), %v600_v1  ;;  %v270_v2 = vld [vmem:[%s759_s2] sm:$0xf] (!%p212_p10)  ;;  %v262_v5 = vunpack.c.l.s4 (!%p212_p10), %v601_v4  ;;  %vm301_vm0 = vcmask (!%p212_p10), 1041408   ;;  %vm297_vm1 = vcmask (!%p212_p10), 31744   ;;  %s240_s27 = sand.u32 (!%p212_p10), 1, %s582_s19  }
  0x10   : > { %259 = vperm.xlu0 (!%p212_p10), %518, %v256_v0   ;;  %519 = vset.pattern.permute.xlu1 (!%p212_p10), %v600_v1  ;;  %v291_v3 = vld [vmem:[%s761_s4] sm:$0xff] (!%p212_p10)  ;;  %v265_v8 = vshrl.u32 (!%p212_p10), %v264_v6, 7  ;;  %s449_s29 = sshll.u32 (!%p212_p10), %s240_s27, 4  ;;  %s460_s7 = sshll.u32 (!%p212_p10), %s590_s21, 8 }
  0x11   : > { %294 = vperm.xlu1 (!%p212_p10), %519, %v291_v3   ;;  %v263_v7 = vunpack.c.0.s8 (!%p212_p10), %v262_v5  ;;  %v285_v22 = vld [vmem:[%s760_s3] sm:$0xf] (!%p212_p10)  ;;  %s242_s8 = scalar_lea.vmem (!%p212_p10), [#allocation2], %s449_s29  ;;  %s710_s12 = scalar_lea.hbm (!%p212_p10), %s762_s5, %s460_s7 }
  0x12   : > { %s368_s9 = sshll.u32 (!%p212_p10), %s242_s8, 4  ;;  %s712_s9 = int_to_ptr.vmem [resolvable:$true] %s368_s9 }
  0x13   : > { %v266_v9 = vsub.s32 (!%p212_p10), %v263_v7, %v265_v8 }
  0x14   : > { %273 = vperm.xlu0 (!%p212_p10), %518, %v270_v2  }
  0x16   : > { %s245_s13 = scalar_select %p244_p11, %s590_s21, 1 }
  0x17   : > { %s352_s21 = scalar_lea.sflag [#allocation3], %s240_s27 }
  0x18   : > { %s459_s14 = sshll.u32 %s245_s13, 3  ;;  %s520_s13 = scalar_lea.vmem %s712_s9, 256 }
  0x19   : > { %s251_s17 = scalar_lea.vmem %s757_s0, %s459_s14  ;;  %p521_p12 = scmp.ne.s32.totalorder %s712_s9, %s520_s13 }
  0x1a   : > { %v255_v12 = vld [vmem:[%s251_s17] sm:$0xff]  ;;  %s602_s14 = smov [#allocation2]  }
  0x1b   : > { %p522_p13 = pnand %p521_p12, %p673_p4  ;;  %s524_s15 = sshll.u32 %s602_s14, 4  ;;  %s525_s15 = int_to_ptr.vmem [resolvable:$false] %s524_s15 }
  0x1c   : > { %s526_s16 = scalar_lea.vmem %s525_s15, 512  ;;  %p527_p1 = scmp.lt.s32.totalorder %s712_s9, %s525_s15 }
  0x1d   : > { %p523_p0 = pneg %p522_p13  ;;  %p528_p2 = scmp.lt.s32.totalorder %s526_s16, %s520_s13 }
  0x1f   : > { %p529_p3 = por %p528_p2, %p527_p1 }
  0x21   : > { %p530_p5 = pnand %p529_p3, %p523_p0 }
  0x8f   : > { %v260_v10 = vpop.permute.xlu0 %259 }
  0x90   : > { %v267_v11 = vrot.slane %v260_v10, %v266_v9  ;;  %v295_v23 = vpop.permute.xlu1 %294 }
  0x92   : > { %v269_v14 = vmul.f32 %v267_v11, %v255_v12 }
  0x93   : > { %v274_v13 = vpop.permute.xlu0 %273 }
  0x94   : > { %v281_v15 = vrot.slane %v274_v13, %v266_v9 }
  0x96   : > { %v283_v16 = vadd.f32 %v281_v15, %v269_v14 }
  0x98   : > { %v284_v17 = vmax.f32 %v283_v16, 0.0 }
  0x9a   : > { %v287_v18 = vcombine.high %v284_v17, %v284_v17  ;;  %v289_v19 = vpack.c.bf16 %v284_v17, %v284_v17 }
  0x9c   : > { %v290_v20 = vpack.c.bf16 %v287_v18, %v287_v18  ;;  %v303_v21 = vsel %vm301_vm0, %v289_v19, 0 }
  0x9e   : > { %452 = vmatprep.subr.msk.bf16.mxu0 %vm301_vm0, %v290_v20 }
  0x9f   : > { %309 = vmatpush1.bf16.msra.mxu0 %v303_v21 }
  0xa2   : > { %453 = vmatmul.mubr.msk.bf16.vlgmr.msra.gmra.mrb[0].mxu0 %vm297_vm1, %v285_v22 }
 0x175   : > { %v342_v24 = vpop.f32.mrb[0].mxu0 }
 0x176   : > { %v343_v25 = vadd.f32 %v342_v24, %v295_v23  ;;  %v344_v26 = vpop.f32.mrb[1].mxu0 }
 0x177   : > { %v345_v27 = vadd.f32 %v344_v26, %v295_v23  ;;  %v346_v28 = vpop.f32.mrb[2].mxu0 }
 0x178   : > { %349 = vst [vmem:[%s242_s8] sm:$0xff] %v343_v25  ;;  %v347_v29 = vpop.f32.mrb[3].mxu0 }
 0x179   : > { %350 = vst [vmem:[%s242_s8 + $0x8] sm:$0xff] %v345_v27 }
 0x17a   : > { %533 = shalt.err (!%p530_p5)
}
 0x17b   : > { %s534_s17 = scalar_lea.hbm %s710_s12, 256  ;;  %s538_s27 = scalar_lea.hbm %s762_s5, 512 }
 0x17c   : > { %p535_p6 = scmp.ne.s32.totalorder %s710_s12, %s534_s17  ;;  %p539_p10 = scmp.lt.u32.totalorder %s710_s12, %s762_s5 }
 0x17d   : > { %p540_p11 = scmp.lt.u32.totalorder %s538_s27, %s534_s17  ;;  %p542_p13 = scmp.lt.u32.totalorder %s534_s17, %s710_s12 }
 0x17e   : > { %p536_p7 = pnand %p535_p6, %p673_p4 }
 0x17f   : > { %p541_p12 = por %p540_p11, %p539_p10 }
 0x180   : > { %p537_p9 = pneg %p536_p7 }
 0x181   : > { %p543_p0 = por %p542_p13, %p541_p12 }
 0x183   : > { %p544_p1 = pnand %p543_p0, %p537_p9 }
 0x185   : > { %547 = shalt.err (!%p544_p1)
}
 0x186   : > { %461 = dma.vmem_to_hbm [thread:$0]  (%p673_p4), %s712_s9, 256, %s710_s12, %s352_s21  }
 0x187 PF: > { %p467_p2 = scmp.ge.s32.totalorder %s598_s23, 2  ;;  %s380_s8 = sand.u32 1, %s578_s18  }
 0x188   : > { %s381_s10 = scalar_lea.sflag [#allocation3], %s380_s8 }
 0x189   : > { %p464_p3 = pnand %p467_p2, %p680_p8 }
 0x18b   : > { %573 = dma.done.wait (!%p464_p3), %s381_s10, 256  }
 0x18c   : > { %575 = vsyncadd (!%p464_p3), %s381_s10, 4294967040  ;;  %s18_s23 = sadd.s32 1, %s598_s23   ;;  %s765_s18 = smov %s582_s19 }
 0x18d   : > { %p15_p5 = scmp.ge.s32.totalorder %s18_s23, 4   ;;  %s766_s19 = smov %s586_s20 }
 0x18e   : > { %s767_s20 = smov %s686_s6  ;;  %s768_s21 = smov %s594_s22 }
 0x18f   : > { %s769_s22 = smov %s771_s26  ;;  %17 = sbr.rel (!%p15_p5) target bundleno = 4 (0x4), region = 75 }
 0x196   :  { %386 = vsyncpa [#allocation3], 1 }
 0x197   :  { %388 = vsyncpa [#allocation3 + $0x1], 1 }

</bundles_post_ra>
